<compile_context>
chip_gen: v6e
topology: v6e:2x2x1
jax: 0.10.0
libtpu: 0.0.40
codegen_flags: <defaults>
</compile_context>

<pallas_src>
import math

import jax
import jax.numpy as jnp
import numpy as np
from jax.experimental import pallas as pl
from jax.experimental.pallas import tpu as pltpu


def _build_pe_table(d_model: int, max_seq_len: int = 100) -> jnp.ndarray:
    """Vectorized, bit-identical reproduction of the module's buffer
    (float64 math, then cast to f32 storage — same as the torch loop)."""
    assert d_model % 2 == 0, "PositionalEncoding requires an even d_model"
    pos = np.arange(max_seq_len, dtype=np.float64)[:, None]        # (S, 1)
    i = np.arange(0, d_model, 2, dtype=np.float64)[None, :]        # (1, D/2)
    pe = np.empty((max_seq_len, d_model), dtype=np.float64)
    pe[:, 0::2] = np.sin(pos / 10000.0 ** (2.0 * i / d_model))
    pe[:, 1::2] = np.cos(pos / 10000.0 ** (2.0 * (i + 1.0) / d_model))
    return jnp.asarray(pe.astype(np.float32))


def _pos_enc_kernel(x_ref, pe_ref, o_ref, *, scale):
    # x_ref: (tB, tL)   pe_ref: (1, tL) f32   o_ref: (tB, tL) promoted dtype
    # Matches torch promotion: x*scale in x's dtype, the add promotes vs f32 pe.
    o_ref[...] = (x_ref[...] * scale + pe_ref[...]).astype(o_ref.dtype)


def _pick_tile(full: int, align: int, target: int) -> int:
    """Largest tile t <= target with (t == full) or (t % align == 0 and t | full);
    falls back to the smallest legal divisor if none fits the target."""
    if full <= target:
        return full
    best = 0
    for t in range(align, target + 1, align):
        if full % t == 0:
            best = t
    if best:
        return best
    t = align
    while t < full:
        if full % t == 0:
            return t
        t += align
    return full


def _maybe_split_for_two_cores(tL, tB, L_pad, B, row_align):
    """On 2-TC chips (v7x) make the grid an even number (>=2) of blocks so the
    megacore can shard it evenly. Prefer splitting rows (keeps lane runs wide
    and preserves pe reuse along the inner axis); fall back to splitting lanes."""

    def n_blocks(tl, tb):
        return (L_pad // tl) * (B // tb)

    n = n_blocks(tL, tB)
    if n >= 2 and n % 2 == 0:
        return tL, tB
    cand = tB // 2
    while cand >= row_align:
        if cand % row_align == 0 and B % cand == 0 and n_blocks(tL, cand) % 2 == 0:
            return tL, cand
        cand //= 2
    cand = tL // 2
    while cand >= 128:
        if cand % 128 == 0 and L_pad % cand == 0 and n_blocks(cand, tB) % 2 == 0:
            return cand, tB
        cand //= 2
    return tL, tB


def positional_encoding_forward(x: jnp.ndarray, pe_full: jnp.ndarray) -> jnp.ndarray:
    """x: (B, S, D); pe_full: (max_seq_len, D) float32 table."""
    B, S, D = x.shape
    max_seq_len, d_model = pe_full.shape
    assert d_model == D, f"pe table d_model {d_model} != input d_model {D}"
    assert S <= max_seq_len, f"seq_len {S} exceeds max_seq_len {max_seq_len}"
    scale = float(math.sqrt(D))

    # ----- generation-tuned budgets (heuristic: v7x has 64 MiB per-TC VMEM) ---
    try:
        vmem_cap = int(pltpu.get_tpu_info().vmem_capacity_bytes)
    except Exception:
        vmem_cap = 64 * 1024 * 1024  # conservative fallback
    if vmem_cap >= 96 * 1024 * 1024:          # v5e / v6e: 128 MiB physical
        target_block_bytes = 8 * 1024 * 1024
        vmem_limit_bytes = 64 * 1024 * 1024
        two_cores = False
    else:                                      # v7x: 64 MiB physical, 2 TCs
        target_block_bytes = 6 * 1024 * 1024
        vmem_limit_bytes = 48 * 1024 * 1024
        two_cores = True

    # ----- flatten (S, D) into one lane-dense axis, pad to a multiple of 128 --
    # NOTE: reshape is free only for standard row-major x; a transposed producer
    # would make XLA materialize a copy outside the kernel (correct, just extra
    # HBM traffic).
    L = S * D
    L_pad = ((L + 127) // 128) * 128
    x2 = x.reshape(B, L)
    pe2 = pe_full[:S].astype(jnp.float32).reshape(1, L)
    if L_pad != L:
        x2 = jnp.pad(x2, ((0, 0), (0, L_pad - L)))
        pe2 = jnp.pad(pe2, ((0, 0), (0, L_pad - L)))

    # Output dtype follows torch promotion against the f32 pe buffer.
    out_dtype = jnp.promote_types(x.dtype, pe2.dtype)

    # ----- dtype-aware (sublane, lane)-legal tile selection ------------------
    itemsize = jnp.dtype(x.dtype).itemsize
    row_align = {4: 8, 2: 16, 1: 32}.get(itemsize, 8)
    lane_target = max(128, target_block_bytes // (itemsize * row_align))
    tL = _pick_tile(L_pad, 128, lane_target)
    row_target = max(row_align, target_block_bytes // (itemsize * tL))
    tB = _pick_tile(B, row_align, row_target)

    if two_cores:
        tL, tB = _maybe_split_for_two_cores(tL, tB, L_pad, B, row_align)

    # Lane axis outermost: pe's block index (0, c) is constant across the inner
    # (row) axis, so the pipeline does not re-fetch it every step.
    grid = (L_pad // tL, B // tB)

    kernel = lambda x_ref, pe_ref, o_ref: _pos_enc_kernel(
        x_ref, pe_ref, o_ref, scale=scale
    )

    out2 = pl.pallas_call(
        kernel,
        out_shape=jax.ShapeDtypeStruct((B, L_pad), out_dtype),
        grid_spec=pl.GridSpec(
            grid=grid,
            in_specs=[
                pl.BlockSpec((tB, tL), lambda c, r: (r, c)),
                pl.BlockSpec((1, tL), lambda c, r: (0, c)),
            ],
            out_specs=pl.BlockSpec((tB, tL), lambda c, r: (r, c)),
        ),
        compiler_params=pltpu.CompilerParams(
            dimension_semantics=("parallel", "parallel"),
            vmem_limit_bytes=vmem_limit_bytes,
        ),
    )(x2, pe2)

    if L_pad != L:
        out2 = out2[:, :L]
    return out2.reshape(B, S, D)


if __name__ == "__main__":
    B, S, D = 2, 8, 32
    MAX_SEQ_LEN = 100

    key = jax.random.PRNGKey(0)
    x = jax.random.normal(key, (B, S, D), dtype=jnp.float32)

    pe_full = _build_pe_table(D, MAX_SEQ_LEN)

    out = positional_encoding_forward(x, pe_full)
    out = jax.block_until_ready(out)

    # Sanity check against plain-JAX reference (same f32 table, same formula).
    ref = x * math.sqrt(D) + pe_full[:S][None, :, :]
    np.testing.assert_allclose(np.asarray(out), np.asarray(ref), rtol=1e-6, atol=1e-6)

    print("KERNEL_OK")
</pallas_src>

<mosaic_0001>
module attributes {stable_mosaic.version = 11 : i64} {
  func.func @_lambda_(%arg0: i32, %arg1: i32, %arg2: memref<2x128xf32, #tpu.memory_space<vmem>>, %arg3: memref<1x128xf32, #tpu.memory_space<vmem>>, %arg4: memref<2x128xf32, #tpu.memory_space<vmem>>) attributes {dimension_semantics = [#tpu.dimension_semantics<parallel>, #tpu.dimension_semantics<parallel>], iteration_bounds = array<i64: 2, 1>, scalar_prefetch = 0 : i64, scratch_operands = 0 : i64, tpu.core_type = #tpu.core_type<tc>, window_params = [{transform_indices = @transform_0, window_bounds = array<i64: 2, 128>}, {transform_indices = @transform_1, window_bounds = array<i64: 1, 128>}, {transform_indices = @transform_2, window_bounds = array<i64: 2, 128>}]} {
    %c0 = arith.constant 0 : index
    %c0_0 = arith.constant 0 : index
    %0 = vector.load %arg2[%c0, %c0_0] : memref<2x128xf32, #tpu.memory_space<vmem>>, vector<2x128xf32>
    %cst = arith.constant 5.65685415 : f32
    %1 = vector.broadcast %cst : f32 to vector<2x128xf32>
    %2 = arith.mulf %0, %1 : vector<2x128xf32>
    %c0_1 = arith.constant 0 : index
    %c0_2 = arith.constant 0 : index
    %3 = vector.load %arg3[%c0_1, %c0_2] : memref<1x128xf32, #tpu.memory_space<vmem>>, vector<1x128xf32>
    %4 = vector.broadcast %3 : vector<1x128xf32> to vector<2x128xf32>
    %5 = arith.addf %2, %4 : vector<2x128xf32>
    %c0_3 = arith.constant 0 : index
    %c0_4 = arith.constant 0 : index
    %6 = vector.load %arg4[%c0_3, %c0_4] : memref<2x128xf32, #tpu.memory_space<vmem>>, vector<2x128xf32>
    tpu.vector_store %arg4[%c0_3, %c0_4], %5 {strides = array<i32>} : memref<2x128xf32, #tpu.memory_space<vmem>>, vector<2x128xf32>,
    return
  }
  func.func @transform_0(%arg0: i32, %arg1: i32) -> (i32, i32) {
    %c0_i32 = arith.constant 0 : i32
    return %arg1, %arg0 : i32, i32
  }
  func.func @transform_1(%arg0: i32, %arg1: i32) -> (i32, i32) {
    %c0_i32 = arith.constant 0 : i32
    %c0_i32_0 = arith.constant 0 : i32
    return %c0_i32, %arg0 : i32, i32
  }
  func.func @transform_2(%arg0: i32, %arg1: i32) -> (i32, i32) {
    %c0_i32 = arith.constant 0 : i32
    return %arg1, %arg0 : i32, i32
  }
}

</mosaic_0001>

<bundles_post_ra>
// kernel: tpu_custom_call.1
= control target key start
LH: loop header
LB: loop body
LE: loop exit
PB: predicated region body
PF: predicated region fallthrough
CT: control target
= control target key end

     0   :  { %7 = vsyncpa [#allocation3], 0  ;;  %s746_s0 = inlined_call_operand.hbm [shape: f32[2,256], index: 0, kind: input, shape index: {}]   ;;  %s747_s1 = inlined_call_operand.hbm [shape: f32[1,256], index: 1, kind: input, shape index: {}]   ;;  %s748_s2 = inlined_call_operand.hbm [shape: f32[2,256], index: 2, kind: output, shape index: {}]  }
   0x1   :  { %9 = vsyncpa [#allocation3 + $0x1], 0 }
   0x2   :  { %10 = vsyncpa [#allocation6], 0 }
   0x3   :  { %12 = vsyncpa [#allocation6 + $0x1], 0 }
   0x4   :  { %13 = vsyncpa [#allocation4], 0 }
   0x5   :  { %15 = vsyncpa [#allocation4 + $0x1], 0  ;;  %s582_s9 = smov 0   ;;  %s584_s10 = smov 0  }
   0x6   :  { %s586_s11 = smov 0   ;;  %s588_s12 = smov 0  }
   0x7   :  { %s590_s13 = smov 0   ;;  %s592_s14 = smov 0  }
   0x8 LB: > { %s340_s15 = sadd.s32 4294967295, %s562_s14   ;;  %s341_s16 = sadd.s32 4294967294, %s562_s14   ;;  %s562_s14 = sphi %s592_s14, %s21_s14   ;;  %s558_s13 = sphi %s590_s13, %s760_s13   ;;  %s554_s12 = sphi %s588_s12, %s759_s12   ;;  %s550_s11 = sphi %s586_s11, %s758_s11   ;;  %s546_s10 = sphi %s584_s10, %s757_s10   ;;  %s542_s9 = sphi %s582_s9, %s756_s9  }
   0x9   : > { %s33_s17 = sadd.s32 1, %s558_s13  ;;  %s42_s18 = sadd.s32 1, %s550_s11 }
   0xa   : > { %p35_p0 = scmp.ge.s32.totalorder %s33_s17, 2  ;;  %p49_p1 = scmp.ne.s32.totalorder %s550_s11, %s546_s10 }
   0xb   : > { %p50_p2 = scmp.eq.s32.totalorder %s562_s14, 0  ;;  %p55_p3 = scmp.ne.s32.totalorder %s546_s10, %s542_s9 }
   0xc   : > { %s762_s17 = smov (%p35_p0, %s33_s17), 0  ;;  %p56_p5 = scmp.eq.s32.totalorder %s340_s15, 0 }
   0xd   : > { %p623_p4 = por %p50_p2, %p49_p1  ;;  %s38_s20 = ssub.s32 %s558_s13, %s762_s17 }
   0xe   : > { %p107_p6 = scmp.eq.s32.totalorder %s340_s15, 1  ;;  %p40_p7 = scmp.eq.s32.totalorder %s38_s20, 0 }
   0xf   : > { %p629_p8 = por %p56_p5, %p55_p3  ;;  %p113_p10 = scmp.eq.s32.totalorder %s341_s16, 1 }
  0x10   : > { %p633_p9 = por %p107_p6, %p49_p1  ;;  %p372_p13 = scmp.lt.s32.totalorder %s562_s14, 2 }
  0x11   : > { %s638_s23 = scalar_select %p40_p7, %s550_s11, %s42_s18  }
  0x12   : > { %p640_p11 = por %p113_p10, %p55_p3  ;;  %s647_s25 = sand.u32 1, %s550_s11  }
  0x13   : > { %s344_s26 = sshll.u32 %s647_s25, 1  ;;  %s345_s27 = sshll.u32 %s558_s13, 5 }
  0x14   : > { %s144_s30 = scalar_lea.hbm %s746_s0, %s345_s27  ;;  %s137_s3 = scalar_lea.vmem [#allocation2], %s344_s26 }
  0x15   : > { %s146_s4 = sshll.u32 %s137_s3, 4  ;;  %p656_p0 = pnand %p372_p13, %p623_p4  ;;  %s147_s4 = int_to_ptr.vmem [resolvable:$true] %s146_s4 }
  0x16   : > { %p347_p1 = scmp.ge.s32.totalorder %s562_s14, 1  ;;  %p168_p2 = scmp.lt.s32.totalorder %s562_s14, 3 }
  0x17   : > { %s134_s6 = scalar_lea.sflag [#allocation3], %s647_s25  ;;  %p424_p3 = pneg %p656_p0 }
  0x18   : > { %s435_s7 = scalar_lea.vmem %s147_s4, 32  ;;  %s564_s8 = smov [#allocation2]  }
  0x19   : > { %p436_p5 = scmp.ne.s32.totalorder %s147_s4, %s435_s7  ;;  %s440_s15 = sshll.u32 %s564_s8, 4  ;;  %s441_s15 = int_to_ptr.vmem [resolvable:$false] %s440_s15 }
  0x1a   : > { %s442_s16 = scalar_lea.vmem %s441_s15, 64  ;;  %p443_p4 = scmp.lt.s32.totalorder %s147_s4, %s441_s15 }
  0x1b   : > { %p438_p6 = pnand %p436_p5, %p424_p3  ;;  %p444_p10 = scmp.lt.s32.totalorder %s442_s16, %s435_s7 }
  0x1d   : > { %p439_p7 = pneg %p438_p6  ;;  %p445_p13 = por %p444_p10, %p443_p4 }
  0x1f   : > { %p446_p12 = pnand %p445_p13, %p439_p7 }
  0x21   : > { %449 = shalt.err (!%p446_p12)
}
  0x22   : > { %364 = dma.hbm_to_vmem [thread:$0]  (!%p656_p0), %s144_s30, 32, %s147_s4, %s134_s6  }
  0x23   : > { %p674_p5 = pnand %p347_p1, %p168_p2  ;;  %s346_s19 = sshll.u32 %s558_s13, 4 }
  0x24   : > { %s156_s20 = scalar_lea.vmem [#allocation5], %s647_s25  ;;  %s161_s29 = scalar_lea.hbm %s747_s1, %s346_s19 }
  0x25   : > { %s163_s26 = sshll.u32 %s156_s20, 4  ;;  %s154_s3 = scalar_lea.sflag [#allocation6], %s647_s25  ;;  %s164_s26 = int_to_ptr.vmem [resolvable:$true] %s163_s26 }
  0x26   : > { %s463_s7 = scalar_lea.vmem %s164_s26, 16  ;;  %s565_s30 = smov [#allocation5]  }
  0x27   : > { %p464_p12 = scmp.ne.s32.totalorder %s164_s26, %s463_s7  ;;  %s468_s4 = sshll.u32 %s565_s30, 4  ;;  %s469_s4 = int_to_ptr.vmem [resolvable:$false] %s468_s4 }
  0x28   : > { %s470_s6 = scalar_lea.vmem %s469_s4, 32  ;;  %p471_p1 = scmp.lt.s32.totalorder %s164_s26, %s469_s4 }
  0x29   : > { %p466_p6 = pnand %p464_p12, %p424_p3  ;;  %p472_p2 = scmp.lt.s32.totalorder %s470_s6, %s463_s7 }
  0x2b   : > { %p467_p7 = pneg %p466_p6  ;;  %p473_p4 = por %p472_p2, %p471_p1 }
  0x2d   : > { %p474_p10 = pnand %p473_p4, %p467_p7 }
  0x2f   : > { %477 = shalt.err (!%p474_p10)
}
  0x30   : > { %367 = dma.hbm_to_vmem [thread:$0]  (!%p656_p0), %s161_s29, 16, %s164_s26, %s154_s3  }
  0x31   : > { %172 = sbr.rel (%p674_p5) target bundleno = 81 (0x51), region = 28  ;;  %s692_s25 = sand.u32 (!%p674_p5), 1, %s546_s10  }
  0x32   : > { %s348_s8 = sshll.u32 (!%p674_p5), %s692_s25, 1  ;;  %s175_s15 = scalar_lea.sflag (!%p674_p5), [#allocation3], %s692_s25 }
  0x33   : > { %s178_s16 = scalar_lea.vmem (!%p674_p5), [#allocation2], %s348_s8 }
  0x36   : > { %529 = dma.done.wait (%p629_p8), %s175_s15, 32  }
  0x37   : > { %531 = vsyncadd (%p629_p8), %s175_s15, 4294967264  ;;  %s184_s5 = scalar_lea.sflag [#allocation6], %s692_s25  ;;  %s186_s18 = scalar_lea.vmem [#allocation5], %s692_s25 }
  0x38   : > { %533 = dma.done.wait (%p629_p8), %s184_s5, 16  }
  0x39   : > { %535 = vsyncadd (%p629_p8), %s184_s5, 4294967280  ;;  %v211_v0 = vld [vmem:[%s178_s16] sm:$0x3]  ;;  %s210_s19 = scalar_lea.vmem [#allocation7], %s348_s8  ;;  %s352_s26 = sshll.u32 %s554_s12, 5 }
  0x3a   : > { %v350_v1 = vld [vmem:[%s186_s18] ss:$0 sm:$0xff]  ;;  %s238_s20 = sshll.u32 %s210_s19, 4  ;;  %v212_v2 = vmul.f32 5.656854, %v211_v0  ;;  %s236_s29 = scalar_lea.hbm %s748_s2, %s352_s26  ;;  %s239_s20 = int_to_ptr.vmem [resolvable:$true] %s238_s20 }
  0x3b   : > { %s223_s3 = scalar_lea.sflag [#allocation4], %s692_s25  ;;  %s478_s7 = scalar_lea.vmem %s239_s20, 32 }
  0x3c   : > { %v220_v3 = vadd.f32 %v350_v1, %v212_v2  ;;  %p479_p0 = scmp.ne.s32.totalorder %s239_s20, %s478_s7  ;;  %s566_s21 = smov [#allocation7]  }
  0x3d   : > { %s482_s30 = sshll.u32 %s566_s21, 4  ;;  %s483_s30 = int_to_ptr.vmem [resolvable:$false] %s482_s30 }
  0x3e   : > { %221 = vst [vmem:[%s210_s19] sm:$0x3] %v220_v3  ;;  %p480_p8 = pnand %p479_p0, %p633_p9  ;;  %s484_s4 = scalar_lea.vmem %s483_s30, 64 }
  0x3f   : > { %p485_p13 = scmp.lt.s32.totalorder %s239_s20, %s483_s30  ;;  %p486_p5 = scmp.lt.s32.totalorder %s484_s4, %s478_s7 }
  0x40   : > { %p481_p3 = pneg %p480_p8 }
  0x41   : > { %p487_p12 = por %p486_p5, %p485_p13 }
  0x43   : > { %p488_p6 = pnand %p487_p12, %p481_p3 }
  0x45   : > { %491 = shalt.err (!%p488_p6)
}
  0x46   : > { %s492_s12 = scalar_lea.hbm %s236_s29, 32  ;;  %s496_s8 = scalar_lea.hbm %s748_s2, 64 }
  0x47   : > { %p493_p7 = scmp.ne.s32.totalorder %s236_s29, %s492_s12  ;;  %p497_p4 = scmp.lt.s32.totalorder %s236_s29, %s748_s2 }
  0x48   : > { %p498_p10 = scmp.lt.s32.totalorder %s496_s8, %s492_s12 }
  0x49   : > { %p494_p1 = pnand %p493_p7, %p633_p9 }
  0x4a   : > { %p499_p0 = por %p498_p10, %p497_p4 }
  0x4b   : > { %p495_p2 = pneg %p494_p1 }
  0x4d   : > { %p500_p8 = pnand %p499_p0, %p495_p2 }
  0x4f   : > { %503 = shalt.err (!%p500_p8)
}
  0x50   : > { %359 = dma.vmem_to_hbm [thread:$0]  (%p633_p9), %s239_s20, 32, %s236_s29, %s223_s3  }
  0x51 PF: > { %s250_s5 = sand.u32 1, %s542_s9   ;;  %p755_p3 = scmp.ge.s32.totalorder %s562_s14, 2 }
  0x52   : > { %s251_s18 = scalar_lea.sflag [#allocation4], %s250_s5 }
  0x53   : > { %p369_p13 = pnand %p755_p3, %p640_p11 }
  0x55   : > { %p370_p5 = pneg %p369_p13 }
  0x57   : > { %537 = dma.done.wait (%p370_p5), %s251_s18, 32  }
  0x58   : > { %539 = vsyncadd (%p370_p5), %s251_s18, 4294967264  ;;  %s21_s14 = sadd.s32 1, %s562_s14   ;;  %s756_s9 = smov %s546_s10 }
  0x59   : > { %p18_p12 = scmp.ge.s32.totalorder %s21_s14, 4   ;;  %s757_s10 = smov %s550_s11 }
  0x5a   : > { %s758_s11 = smov %s638_s23  ;;  %s759_s12 = smov %s558_s13 }
  0x5b   : > { %s760_s13 = smov %s762_s17  ;;  %20 = sbr.rel (!%p18_p12) target bundleno = 8 (0x8), region = 86 }
  0x60   :  { %256 = vsyncpa [#allocation3], 1 }
  0x61   :  { %258 = vsyncpa [#allocation3 + $0x1], 1 }
  0x62   :  { %259 = vsyncpa [#allocation6], 1 }
  0x63   :  { %261 = vsyncpa [#allocation6 + $0x1], 1 }
  0x64   :  { %262 = vsyncpa [#allocation4], 1 }
  0x65   :  { %264 = vsyncpa [#allocation4 + $0x1], 1 }

</bundles_post_ra>
